<compile_context>
chip_gen: v6e
topology: v6e:2x2x1
jax: 0.10.0
libtpu: 0.0.40
codegen_flags: <defaults>
</compile_context>

<pallas_src>
import jax
import jax.numpy as jnp
from jax.experimental import pallas as pl
from jax.experimental.pallas import tpu as pltpu

_LAMBDA = 0.0051


def _cdiv(a, b):
    return -(-a // b)


def _vmem_capacity_bytes():
    """Physical VMEM per TensorCore (generation-aware), safe fallback."""
    try:
        return int(pltpu.get_tpu_info().vmem_capacity_bytes)
    except Exception:
        return 64 * 1024 * 1024      # v7x per-TC size: the conservative default


def _num_tensorcores():
    """2 for dual-TC / megacore parts (v4, v5p, v7x); 1 otherwise."""
    try:
        kind = jax.devices()[0].device_kind.lower()
    except Exception:
        return 1
    if any(t in kind for t in ("v2", "v3", "v5e", "v5 lite", "v5lite",
                               "v6e", "v6 lite", "v6lite")):
        return 1
    if any(t in kind for t in ("v4", "v5p", "v7", "7x")):
        return 2
    return 1


def _input_spec(block_shape, index_map, n_bufs):
    """Input BlockSpec with optional deeper pipelining (graceful fallback)."""
    if n_bufs > 2:
        try:
            return pl.BlockSpec(block_shape, index_map,
                                pipeline_mode=pl.Buffered(n_bufs))
        except Exception:            # older jax: no pipeline_mode kwarg
            pass
    return pl.BlockSpec(block_shape, index_map)


def _barlow_kernel(x_ref, y_ref, gx_ref, gy_ref, s_ref):
    """One (B, TILE_D) chunk of features.

    x_ref, y_ref   : (B, TILE_D) tiles of X and Y (feature axis on lanes).
    gx_ref, gy_ref : (B, B) partial Gram outputs, resident across the inner axis.
    s_ref          : (1, TILE_D) write-only stream of s_i = sum_b X_bi * Y_bi.
    """
    t = pl.program_id(1)

    @pl.when(t == 0)
    def _init():
        gx_ref[...] = jnp.zeros_like(gx_ref)
        gy_ref[...] = jnp.zeros_like(gy_ref)

    x = x_ref[...]                       # (B, TILE_D)
    y = y_ref[...]                       # (B, TILE_D)

    # Deep-K Gram matmuls on the MXU: contract over the feature (lane) axis.
    # NOTE: if a Mosaic dump ever shows an explicit vxpose for the trans-B
    # operand, switch to pl.dot(x, x, trans_b=True); the dot_general form
    # below is the verified-working path.
    gx_ref[...] += jax.lax.dot_general(
        x, x, dimension_numbers=(((1,), (1,)), ((), ())),
        preferred_element_type=jnp.float32)
    gy_ref[...] += jax.lax.dot_general(
        y, y, dimension_numbers=(((1,), (1,)), ((), ())),
        preferred_element_type=jnp.float32)

    # Per-feature (unnormalized) diagonal terms, written straight out
    # lane-dense (no resident RMW accumulator, no in-kernel square).
    s_ref[...] = jnp.sum(x.astype(jnp.float32) * y.astype(jnp.float32),
                         axis=0, keepdims=True)


def barlow_twins_loss(features, *, stream_dtype=None, max_tile_d=None):
    """features: (B, 2, ...) array. Returns the scalar Barlow-Twins loss (f32).

    stream_dtype : optionally downcast inputs (e.g. jnp.bfloat16) before the
                   kernel; Gram accumulation remains f32. Halves HBM traffic
                   for f32 inputs of this memory-bound kernel.
    max_tile_d   : optional cap on the feature-tile width (testing knob).
    """
    if features.ndim < 3:
        raise ValueError("`features` needs to be [bsz, n_views, ...], "
                         "at least 3 dimensions are required")
    if features.shape[1] != 2:
        raise ValueError("`features.shape[1]` needs to be 2")

    b = features.shape[0]
    feats = features.reshape(b, 2, -1)
    if stream_dtype is not None:
        feats = feats.astype(stream_dtype)
    elif feats.dtype not in (jnp.float32, jnp.bfloat16):
        feats = feats.astype(jnp.float32)
    d = feats.shape[-1]
    itemsize = feats.dtype.itemsize

    # ---- Generation-aware tile selection -----------------------------------
    multi_tc = _num_tensorcores() >= 2
    cap = _vmem_capacity_bytes()
    # Headroom for compiler-internal scratch: ~40 MiB budget on v7x (64 MiB/TC),
    # ~80 MiB on v5e/v6e (128 MiB/TC).
    budget = max(min(cap * 5 // 8, cap - (24 << 20)), 12 << 20)

    n_in_bufs = 3                                   # deeper input pipelining
    gram_resident = 2 * 2 * b * b * 4               # gx/gy f32, double-buffered
    per128 = 2 * n_in_bufs * b * 128 * itemsize + 2 * 128 * 4
    avail = budget - gram_resident - (1 << 20)
    tile_cap = min(max(avail // per128, 1) * 128, 2048)
    if max_tile_d is not None:
        tile_cap = min(tile_cap, max((max_tile_d // 128) * 128, 128))

    # Pad the feature axis up to a whole number of *large* tiles (no 128-lane
    # fallback for awkward D): zero-padded features contribute nothing to the
    # Grams or the diagonal sums (the true D is used in the final formula).
    d128 = _cdiv(d, 128) * 128
    n_tiles = _cdiv(d128, tile_cap)
    if multi_tc:
        if n_tiles == 1 and d128 >= 256:
            n_tiles = 2          # give each TensorCore its own feature range
        elif n_tiles > 1 and n_tiles % 2:
            n_tiles += 1         # keep the 2-way outer split rectangular
    tile_d = _cdiv(_cdiv(d128, n_tiles), 128) * 128
    d_pad = tile_d * n_tiles

    # Outer split only on dual-TC parts; on single-TC chips it would just
    # double the resident Gram footprint for zero parallelism.
    n_outer = 2 if (multi_tc and n_tiles >= 2) else 1
    n_inner = n_tiles // n_outer
    if n_outer * n_inner < 3:
        n_in_bufs = 2            # no point in a 3rd buffer for a 1-2 step grid

    if d_pad != d:
        feats = jnp.pad(feats, ((0, 0), (0, 0), (0, d_pad - d)))
    # (B, 2, Dp) -> (B, 2*Dp) is a layout-preserving (free) reshape:
    # X lives in columns [0, Dp), Y in [Dp, 2*Dp).  No X/Y pre-copies.
    flat = feats.reshape(b, 2 * d_pad)

    x_map = lambda c, t: (0, c * n_inner + t)
    y_map = lambda c, t: (0, n_tiles + c * n_inner + t)

    est_vmem = (gram_resident + 2 * n_in_bufs * b * tile_d * itemsize
                + 2 * tile_d * 4)
    vmem_limit = int(min(cap, max(est_vmem + (8 << 20), 32 << 20)))

    cost = pl.CostEstimate(
        flops=4 * b * b * d_pad + 2 * b * d_pad,
        transcendentals=0,
        bytes_accessed=2 * b * d_pad * itemsize
        + n_outer * 2 * b * b * 4 + d_pad * 4,
    )

    gx_parts, gy_parts, s_flat = pl.pallas_call(
        _barlow_kernel,
        out_shape=(
            jax.ShapeDtypeStruct((n_outer, b, b), jnp.float32),
            jax.ShapeDtypeStruct((n_outer, b, b), jnp.float32),
            jax.ShapeDtypeStruct((1, d_pad), jnp.float32),
        ),
        grid_spec=pltpu.PrefetchScalarGridSpec(
            num_scalar_prefetch=0,
            grid=(n_outer, n_inner),
            in_specs=[
                _input_spec((b, tile_d), x_map, n_in_bufs),   # X tile
                _input_spec((b, tile_d), y_map, n_in_bufs),   # Y tile
            ],
            out_specs=[
                pl.BlockSpec((None, b, b), lambda c, t: (c, 0, 0)),
                pl.BlockSpec((None, b, b), lambda c, t: (c, 0, 0)),
                pl.BlockSpec((1, tile_d), lambda c, t: (0, c * n_inner + t)),
            ],
        ),
        compiler_params=pltpu.CompilerParams(
            # "parallel" shards the outer axis across TensorCores on dual-TC
            # parts; if a v7x Mosaic dump shows it staying on one core, switch
            # to (pltpu.CORE_PARALLEL, pltpu.ARBITRARY).
            dimension_semantics=("parallel", "arbitrary"),
            vmem_limit_bytes=vmem_limit,
        ),
        cost_estimate=cost,
    )(flat, flat)

    # Tiny O(B^2 + D) combine in plain JAX.
    gx = jnp.sum(gx_parts, axis=0)                       # X X^T  (B, B)
    gy = jnp.sum(gy_parts, axis=0)                       # Y Y^T  (B, B)
    s = s_flat[0]                                        # (Dp,)  s_i = sum_b X_bi Y_bi
    inv_b = 1.0 / b
    frob = jnp.sum(gx * gy) * (inv_b * inv_b)            # ||C||_F^2
    diag_sum = jnp.sum(s) * inv_b                        # sum_i C_ii
    diag_sq = jnp.sum(s * s) * (inv_b * inv_b)           # sum_i C_ii^2
    on_diag = diag_sq - 2.0 * diag_sum + d               # sum_i (C_ii - 1)^2
    off_diag = frob - diag_sq                            # sum_{i != j} C_ij^2
    return (on_diag + _LAMBDA * off_diag).astype(jnp.float32)


def _reference_loss(features):
    b = features.shape[0]
    feats = features.reshape(b, 2, -1).astype(jnp.float32)
    x, y = feats[:, 0, :], feats[:, 1, :]
    c = jnp.einsum("bi,bj->ij", x, y,
                   precision=jax.lax.Precision.HIGHEST) / b
    n = c.shape[0]
    eye = jnp.eye(n, dtype=bool)
    on_diag = jnp.sum((jnp.diagonal(c) - 1.0) ** 2)
    off_diag = jnp.sum(jnp.where(eye, 0.0, c) ** 2)
    return on_diag + _LAMBDA * off_diag


if __name__ == "__main__":
    key = jax.random.PRNGKey(0)

    # Case 1: default f32 streaming, single-tile path (B=8, D=256).
    feats1 = jax.random.normal(key, (8, 2, 16, 16), dtype=jnp.float32)
    loss1 = jax.block_until_ready(barlow_twins_loss(feats1))
    ref1 = jax.block_until_ready(_reference_loss(feats1))
    assert jnp.allclose(loss1, ref1, rtol=2e-3, atol=1e-2), (loss1, ref1)

    # Case 2: awkward D (336, not a multiple of 128) + forced multi-tile path
    # (exercises padding, the resident Gram accumulation and Buffered(3)).
    feats2 = jax.random.normal(jax.random.PRNGKey(1), (8, 2, 3, 112),
                               dtype=jnp.float32)
    loss2 = jax.block_until_ready(barlow_twins_loss(feats2, max_tile_d=128))
    ref2 = jax.block_until_ready(_reference_loss(feats2))
    assert jnp.allclose(loss2, ref2, rtol=2e-3, atol=1e-2), (loss2, ref2)

    # Case 3: bf16 streaming (half the HBM traffic), looser tolerance.
    loss3 = jax.block_until_ready(
        barlow_twins_loss(feats1, stream_dtype=jnp.bfloat16))
    assert jnp.allclose(loss3, ref1, rtol=3e-2, atol=0.5), (loss3, ref1)

    print("KERNEL_OK")
</pallas_src>

<mosaic_0001>
module attributes {stable_mosaic.version = 11 : i64} {
  func.func @_barlow_kernel(%arg0: i32, %arg1: i32, %arg2: memref<8x256xf32, #tpu.memory_space<vmem>>, %arg3: memref<8x256xf32, #tpu.memory_space<vmem>>, %arg4: memref<1x8x8xf32, #tpu.memory_space<vmem>>, %arg5: memref<1x8x8xf32, #tpu.memory_space<vmem>>, %arg6: memref<1x256xf32, #tpu.memory_space<vmem>>) attributes {dimension_semantics = [#tpu.dimension_semantics<parallel>, #tpu.dimension_semantics<arbitrary>], iteration_bounds = array<i64: 1, 1>, scalar_prefetch = 0 : i64, scratch_operands = 0 : i64, tpu.core_type = #tpu.core_type<tc>, window_params = [{transform_indices = @transform_0, window_bounds = array<i64: 8, 256>}, {transform_indices = @transform_1, window_bounds = array<i64: 8, 256>}, {transform_indices = @transform_2, window_bounds = array<i64: 1, 8, 8>}, {transform_indices = @transform_3, window_bounds = array<i64: 1, 8, 8>}, {transform_indices = @transform_4, window_bounds = array<i64: 1, 256>}]} {
    %c0_i32 = arith.constant 0 : i32
    %0 = arith.cmpi eq, %arg1, %c0_i32 : i32
    %1 = arith.extui %0 : i1 to i32
    %c0_i32_0 = arith.constant 0 : i32
    %2 = arith.cmpi ne, %1, %c0_i32_0 : i32
    scf.if %2 {
      %cst_20 = arith.constant 0.000000e+00 : f32
      %23 = vector.broadcast %cst_20 : f32 to vector<8x8xf32>
      %c0_21 = arith.constant 0 : index
      %c0_22 = arith.constant 0 : index
      %c0_23 = arith.constant 0 : index
      %24 = vector.load %arg4[%c0_21, %c0_22, %c0_23] : memref<1x8x8xf32, #tpu.memory_space<vmem>>, vector<1x8x8xf32>
      %25 = vector.shape_cast %24 : vector<1x8x8xf32> to vector<8x8xf32>
      %26 = vector.shape_cast %23 : vector<8x8xf32> to vector<1x8x8xf32>
      tpu.vector_store %arg4[%c0_21, %c0_22, %c0_23], %26 {strides = array<i32>} : memref<1x8x8xf32, #tpu.memory_space<vmem>>, vector<1x8x8xf32>,
      %cst_24 = arith.constant 0.000000e+00 : f32
      %27 = vector.broadcast %cst_24 : f32 to vector<8x8xf32>
      %c0_25 = arith.constant 0 : index
      %c0_26 = arith.constant 0 : index
      %c0_27 = arith.constant 0 : index
      %28 = vector.load %arg5[%c0_25, %c0_26, %c0_27] : memref<1x8x8xf32, #tpu.memory_space<vmem>>, vector<1x8x8xf32>
      %29 = vector.shape_cast %28 : vector<1x8x8xf32> to vector<8x8xf32>
      %30 = vector.shape_cast %27 : vector<8x8xf32> to vector<1x8x8xf32>
      tpu.vector_store %arg5[%c0_25, %c0_26, %c0_27], %30 {strides = array<i32>} : memref<1x8x8xf32, #tpu.memory_space<vmem>>, vector<1x8x8xf32>,
    } else {
    }
    %c0 = arith.constant 0 : index
    %c0_1 = arith.constant 0 : index
    %3 = vector.load %arg2[%c0, %c0_1] : memref<8x256xf32, #tpu.memory_space<vmem>>, vector<8x256xf32>
    %c0_2 = arith.constant 0 : index
    %c0_3 = arith.constant 0 : index
    %4 = vector.load %arg3[%c0_2, %c0_3] : memref<8x256xf32, #tpu.memory_space<vmem>>, vector<8x256xf32>
    %c0_4 = arith.constant 0 : index
    %c0_5 = arith.constant 0 : index
    %c0_6 = arith.constant 0 : index
    %5 = vector.load %arg4[%c0_4, %c0_5, %c0_6] : memref<1x8x8xf32, #tpu.memory_space<vmem>>, vector<1x8x8xf32>
    %6 = vector.shape_cast %5 : vector<1x8x8xf32> to vector<8x8xf32>
    %cst = arith.constant dense<0.000000e+00> : vector<8x8xf32>
    %7 = tpu.matmul %3, %3, %cst {dimension_numbers = #tpu.dot_dimension_numbers<[1], [1], [0], [0], [0, 0, 1, 0], [], []>} : vector<8x256xf32>, vector<8x256xf32>, vector<8x8xf32> -> vector<8x8xf32>
    %8 = arith.addf %6, %7 : vector<8x8xf32>
    %c0_7 = arith.constant 0 : index
    %c0_8 = arith.constant 0 : index
    %c0_9 = arith.constant 0 : index
    %9 = vector.load %arg4[%c0_7, %c0_8, %c0_9] : memref<1x8x8xf32, #tpu.memory_space<vmem>>, vector<1x8x8xf32>
    %10 = vector.shape_cast %9 : vector<1x8x8xf32> to vector<8x8xf32>
    %11 = vector.shape_cast %8 : vector<8x8xf32> to vector<1x8x8xf32>
    tpu.vector_store %arg4[%c0_7, %c0_8, %c0_9], %11 {strides = array<i32>} : memref<1x8x8xf32, #tpu.memory_space<vmem>>, vector<1x8x8xf32>,
    %c0_10 = arith.constant 0 : index
    %c0_11 = arith.constant 0 : index
    %c0_12 = arith.constant 0 : index
    %12 = vector.load %arg5[%c0_10, %c0_11, %c0_12] : memref<1x8x8xf32, #tpu.memory_space<vmem>>, vector<1x8x8xf32>
    %13 = vector.shape_cast %12 : vector<1x8x8xf32> to vector<8x8xf32>
    %cst_13 = arith.constant dense<0.000000e+00> : vector<8x8xf32>
    %14 = tpu.matmul %4, %4, %cst_13 {dimension_numbers = #tpu.dot_dimension_numbers<[1], [1], [0], [0], [0, 0, 1, 0], [], []>} : vector<8x256xf32>, vector<8x256xf32>, vector<8x8xf32> -> vector<8x8xf32>
    %15 = arith.addf %13, %14 : vector<8x8xf32>
    %c0_14 = arith.constant 0 : index
    %c0_15 = arith.constant 0 : index
    %c0_16 = arith.constant 0 : index
    %16 = vector.load %arg5[%c0_14, %c0_15, %c0_16] : memref<1x8x8xf32, #tpu.memory_space<vmem>>, vector<1x8x8xf32>
    %17 = vector.shape_cast %16 : vector<1x8x8xf32> to vector<8x8xf32>
    %18 = vector.shape_cast %15 : vector<8x8xf32> to vector<1x8x8xf32>
    tpu.vector_store %arg5[%c0_14, %c0_15, %c0_16], %18 {strides = array<i32>} : memref<1x8x8xf32, #tpu.memory_space<vmem>>, vector<1x8x8xf32>,
    %19 = arith.mulf %3, %4 : vector<8x256xf32>
    %cst_17 = arith.constant dense<0.000000e+00> : vector<256xf32>
    %20 = vector.multi_reduction <add>, %19, %cst_17 [0] : vector<8x256xf32> to vector<256xf32>
    %21 = vector.shape_cast %20 : vector<256xf32> to vector<1x256xf32>
    %c0_18 = arith.constant 0 : index
    %c0_19 = arith.constant 0 : index
    %22 = vector.load %arg6[%c0_18, %c0_19] : memref<1x256xf32, #tpu.memory_space<vmem>>, vector<1x256xf32>
    tpu.vector_store %arg6[%c0_18, %c0_19], %21 {strides = array<i32>} : memref<1x256xf32, #tpu.memory_space<vmem>>, vector<1x256xf32>,
    return
  }
  func.func @transform_0(%arg0: i32, %arg1: i32) -> (i32, i32) {
    %c1_i32 = arith.constant 1 : i32
    %0 = arith.muli %arg0, %c1_i32 : i32
    %1 = arith.addi %0, %arg1 : i32
    %c0_i32 = arith.constant 0 : i32
    %c0_i32_0 = arith.constant 0 : i32
    return %c0_i32, %1 : i32, i32
  }
  func.func @transform_1(%arg0: i32, %arg1: i32) -> (i32, i32) {
    %c1_i32 = arith.constant 1 : i32
    %0 = arith.muli %arg0, %c1_i32 : i32
    %c1_i32_0 = arith.constant 1 : i32
    %1 = arith.addi %c1_i32_0, %0 : i32
    %2 = arith.addi %1, %arg1 : i32
    %c0_i32 = arith.constant 0 : i32
    %c0_i32_1 = arith.constant 0 : i32
    return %c0_i32, %2 : i32, i32
  }
  func.func @transform_2(%arg0: i32, %arg1: i32) -> (i32, i32, i32) {
    %c0_i32 = arith.constant 0 : i32
    %c0_i32_0 = arith.constant 0 : i32
    %c0_i32_1 = arith.constant 0 : i32
    return %arg0, %c0_i32, %c0_i32_0 : i32, i32, i32
  }
  func.func @transform_3(%arg0: i32, %arg1: i32) -> (i32, i32, i32) {
    %c0_i32 = arith.constant 0 : i32
    %c0_i32_0 = arith.constant 0 : i32
    %c0_i32_1 = arith.constant 0 : i32
    return %arg0, %c0_i32, %c0_i32_0 : i32, i32, i32
  }
  func.func @transform_4(%arg0: i32, %arg1: i32) -> (i32, i32) {
    %c1_i32 = arith.constant 1 : i32
    %0 = arith.muli %arg0, %c1_i32 : i32
    %1 = arith.addi %0, %arg1 : i32
    %c0_i32 = arith.constant 0 : i32
    %c0_i32_0 = arith.constant 0 : i32
    return %c0_i32, %1 : i32, i32
  }
}

</mosaic_0001>

<bundles_post_ra>
// kernel: tpu_custom_call.1
= control target key start
LH: loop header
LB: loop body
LE: loop exit
PB: predicated region body
PF: predicated region fallthrough
CT: control target
= control target key end

     0   :  { %10 = vsyncpa [#allocation3], 0  ;;  %s468_s0 = inlined_call_operand.hbm [shape: f32[8,512], index: 0, kind: input, shape index: {}]   ;;  %s469_s1 = inlined_call_operand.hbm [shape: f32[8,512], index: 1, kind: input, shape index: {}]   ;;  %s470_s2 = inlined_call_operand.hbm [shape: f32[1,8,8], index: 2, kind: output, shape index: {0}]   ;;  %s471_s3 = inlined_call_operand.hbm [shape: f32[1,8,8], index: 3, kind: output, shape index: {1}]   ;;  %s472_s4 = inlined_call_operand.hbm [shape: f32[1,256], index: 4, kind: output, shape index: {2}]  }
   0x1   :  { %11 = vsyncpa [#allocation6], 0 }
   0x2   :  { %12 = vsyncpa [#allocation4], 0 }
   0x3   :  { %13 = vsyncpa [#allocation9], 0  ;;  %s298_s17 = scalar_lea.hbm %s469_s1, 256  ;;  %s417_s18 = smov [#allocation2]  }
   0x4   :  { %s24_s19 = sshll.u32 %s417_s18, 4  ;;  %s418_s20 = smov [#allocation5]   ;;  %s25_s19 = int_to_ptr.vmem [resolvable:$true] %s24_s19 }
   0x5   :  { %s39_s21 = sshll.u32 %s418_s20, 4  ;;  %s314_s22 = scalar_lea.vmem %s25_s19, 256  ;;  %s40_s21 = int_to_ptr.vmem [resolvable:$true] %s39_s21 }
   0x6   :  { %p315_p0 = scmp.ne.s32.totalorder %s25_s19, %s314_s22  ;;  %p319_p1 = scmp.lt.s32.totalorder %s25_s19, %s25_s19 }
   0x7   :  { %p320_p2 = scmp.lt.s32.totalorder %s314_s22, %s314_s22 }
   0x9   :  { %p321_p3 = por %p320_p2, %p319_p1 }
   0xb   :  { %p322_p4 = pnand %p321_p3, %p315_p0 }
   0xd   :  { %325 = shalt.err (!%p322_p4)
}
   0xe   :  { %27 = dma.hbm_to_vmem [thread:$0]  %s468_s0, 256, %s25_s19, [#allocation3]  }
   0xf   :  { %s336_s25 = scalar_lea.vmem %s40_s21, 256  ;;  %p341_p6 = scmp.lt.s32.totalorder %s40_s21, %s40_s21 }
  0x10   :  { %p337_p5 = scmp.ne.s32.totalorder %s40_s21, %s336_s25  ;;  %p342_p7 = scmp.lt.s32.totalorder %s336_s25, %s336_s25 }
  0x12   :  { %p343_p8 = por %p342_p7, %p341_p6 }
  0x14   :  { %p344_p9 = pnand %p343_p8, %p337_p5 }
  0x16   :  { %347 = shalt.err (!%p344_p9)
}
  0x17   :  { %42 = dma.hbm_to_vmem [thread:$0]  %s298_s17, 256, %s40_s21, [#allocation6]  }
  0x18   :  { %409 = dma.done.wait [#allocation3], 256  }
  0x19   :  { %410 = vsyncadd [#allocation3], 4294967040 }
  0x1a   :  { %411 = dma.done.wait [#allocation6], 256  }
  0x1b   :  { %412 = vsyncadd [#allocation6], 4294967040  ;;  %vm60_vm0 = vcmask 64512   ;;  %v419_v0 = vmov 0.0   ;;  %v64_v1 = vld [vmem:[#allocation2 + $0x8] sm:$0xff]  ;;  %v66_v2 = vld [vmem:[#allocation5 + $0x8] sm:$0xff]  ;;  %v234_v21 = vlaneseq }
  0x1c   :  { %61 = vst.msk [vmem:[#allocation7] sm:$0xff] %vm60_vm0, %v419_v0  ;;  %62 = vst.msk [vmem:[#allocation8] sm:$0xff] %vm60_vm0, %v419_v0  ;;  %v63_v3 = vld [vmem:[#allocation2] sm:$0xff]  ;;  %98 = vmatprep.subr.mxu0 %v64_v1  ;;  %172 = vmatprep.subr.mxu1 %v66_v2  ;;  %v65_v4 = vld [vmem:[#allocation5] sm:$0xff]  ;;  %v215_v5 = vmul.f32 %v66_v2, %v64_v1  ;;  %v420_v19 = vmov 1966171168  }
  0x1d   :  { %99 = vmatpush1.xpose.msra.mxu0 %v63_v3  ;;  %173 = vmatpush1.xpose.msra.mxu1 %v65_v4  ;;  %v214_v6 = vmul.f32 %v65_v4, %v63_v3  ;;  %v232_v20 = vunpack.c.l.s4 %v420_v19  ;;  %v235_v23 = vshrl.u32 %v234_v21, 7  ;;  %vm248_vm1 = vcmp.lt.s32.totalorder %v234_v21, 256  ;;  %s421_s0 = smov [#allocation8]   ;;  %s422_s26 = smov [#allocation7]  }
  0x1e   :  { %132 = vmatprep.mubr.f32.mxu0 %v64_v1  ;;  %206 = vmatprep.mubr.f32.mxu1 %v66_v2  ;;  %v222_v7 = vrot.slane %v215_v5, 4  ;;  %s267_s1 = sshll.u32 %s421_s0, 4  ;;  %s257_s27 = sshll.u32 %s422_s26, 4  ;;  %s268_s1 = int_to_ptr.vmem [resolvable:$true] %s267_s1  ;;  %s258_s27 = int_to_ptr.vmem [resolvable:$true] %s257_s27 }
  0x1f   :  { %v216_v8 = vrot.slane %v214_v6, 4  ;;  %v233_v22 = vunpack.c.0.s8 %v232_v20  ;;  %s423_s28 = smov [#allocation10]   ;;  %s349_s30 = scalar_lea.vmem %s268_s1, 128 }
  0x20   :  { %133 = vmatmul.mubr.f32.vlgmr.msra.gmra.mxu0 %v63_v3  ;;  %207 = vmatmul.mubr.f32.vlgmr.msra.gmra.mxu1 %v65_v4  ;;  %v223_v9 = vadd.f32 %v222_v7, %v215_v5  ;;  %s281_s29 = sshll.u32 %s423_s28, 4  ;;  %p350_p10 = scmp.ne.s32.totalorder %s268_s1, %s349_s30  ;;  %s282_s29 = int_to_ptr.vmem [resolvable:$true] %s281_s29 }
  0x21   :  { %v217_v10 = vadd.f32 %v216_v8, %v214_v6  ;;  %v236_v25 = vsub.s32 %v233_v22, %v235_v23  ;;  %p354_p11 = scmp.lt.s32.totalorder %s268_s1, %s268_s1  ;;  %p355_p12 = scmp.lt.s32.totalorder %s349_s30, %s349_s30 }
  0x22   :  { %v224_v11 = vrot.slane %v223_v9, 2 }
  0x23   :  { %v218_v12 = vrot.slane %v217_v10, 2  ;;  %v67_v28 = vld [vmem:[#allocation7] sm:$0xff]  ;;  %v141_v29 = vld [vmem:[#allocation8] sm:$0xff]  ;;  %p356_p13 = por %p355_p12, %p354_p11 }
  0x24   :  { %v225_v13 = vadd.f32 %v224_v11, %v223_v9 }
  0x25   :  { %v219_v14 = vadd.f32 %v218_v12, %v217_v10  ;;  %p357_p0 = pnand %p356_p13, %p350_p10 }
  0x26   :  { %v226_v15 = vrot.slane %v225_v13, 1 }
  0x27   :  { %v220_v16 = vrot.slane %v219_v14, 1 }
  0x28   :  { %v227_v17 = vadd.f32 %v226_v15, %v225_v13 }
  0x29   :  { %v221_v18 = vadd.f32 %v220_v16, %v219_v14 }
  0x2b   :  { %v230_v24 = vcombine.low %v221_v18, %v227_v17 }
  0x2d   :  { %v237_v26 = vrot.slane %v230_v24, %v236_v25 }
  0x2f   :  { %v244_v27 = vrot.slane %v237_v26, %v236_v25 }
  0x31   :  { %250 = vst.msk [vmem:[#allocation10] sm:$0x3] %vm248_vm1, %v244_v27 }
  0xe0   :  { %v134_v30 = vpop.f32.mrf.mxu0  ;;  %v208_v31 = vpop.f32.mrf.mxu1 }
  0xe1   :  { %v138_v32 = vadd.f32 %v134_v30, %v67_v28  ;;  %v212_v33 = vadd.f32 %v208_v31, %v141_v29 }
  0xe2   :  { %v136_v34 = vpop.f32.mrf.mxu0  ;;  %v210_v35 = vpop.f32.mrf.mxu1 }
  0xe3   :  { %140 = vst.msk [vmem:[#allocation7] sm:$0xff] %vm60_vm0, %v138_v32  ;;  %213 = vst.msk [vmem:[#allocation8] sm:$0xff] %vm60_vm0, %v212_v33 }
  0xe4   :  { %360 = shalt.err (!%p357_p0)
}
  0xe5   :  { %270 = dma.vmem_to_hbm [thread:$0]  %s268_s1, 128, %s471_s3, [#allocation9]  }
  0xe6   :  { %s369_s7 = scalar_lea.vmem %s258_s27, 128  ;;  %p374_p2 = scmp.lt.s32.totalorder %s258_s27, %s258_s27 }
  0xe7   :  { %p370_p1 = scmp.ne.s32.totalorder %s258_s27, %s369_s7  ;;  %p375_p3 = scmp.lt.s32.totalorder %s369_s7, %s369_s7 }
  0xe9   :  { %p376_p4 = por %p375_p3, %p374_p2 }
  0xeb   :  { %p377_p5 = pnand %p376_p4, %p370_p1 }
  0xed   :  { %380 = shalt.err (!%p377_p5)
}
  0xee   :  { %260 = dma.vmem_to_hbm [thread:$0]  %s258_s27, 128, %s470_s2, [#allocation4]  }
  0xef   :  { %s389_s10 = scalar_lea.vmem %s282_s29, 32  ;;  %p394_p7 = scmp.lt.s32.totalorder %s282_s29, %s282_s29 }
  0xf0   :  { %p390_p6 = scmp.ne.s32.totalorder %s282_s29, %s389_s10  ;;  %p395_p8 = scmp.lt.s32.totalorder %s389_s10, %s389_s10 }
  0xf2   :  { %p396_p9 = por %p395_p8, %p394_p7 }
  0xf4   :  { %p397_p10 = pnand %p396_p9, %p390_p6 }
  0xf6   :  { %400 = shalt.err (!%p397_p10)
}
  0xf7   :  { %284 = dma.vmem_to_hbm [thread:$0]  %s282_s29, 32, %s472_s4, [#allocation9]  }
  0xf8   :  { %413 = dma.done.wait [#allocation4], 128  }
  0xf9   :  { %414 = vsyncadd [#allocation4], 4294967168 }
  0xfa   :  { %415 = dma.done.wait [#allocation9], 160  }
  0xfb   :  { %416 = vsyncadd [#allocation9], 4294967136 }
  0xfc   :  { %294 = vsyncpa [#allocation3], 1 }
  0xfd   :  { %295 = vsyncpa [#allocation6], 1 }
  0xfe   :  { %296 = vsyncpa [#allocation4], 1 }
  0xff   :  { %297 = vsyncpa [#allocation9], 1 }

</bundles_post_ra>
